<compile_context>
chip_gen: v7x
topology: tpu7x:2x2x1
jax: 0.10.0
libtpu: 0.0.40
codegen_flags: <defaults>
</compile_context>

<pallas_src>
import jax
import jax.numpy as jnp
import numpy as np
from jax.experimental import pallas as pl
from jax.experimental.pallas import tpu as pltpu


def _scale_mul_kernel(x_ref, s_ref, o_ref):
    """Broadcast-multiply hot path (pure VPU; kernel is HBM-bandwidth-bound).

    x_ref : (1, c_tile, hw_tile)  input tile (HW on the fast lane axis)
    s_ref : (1, c_tile, 1)        float32 per-(batch, channel) scale = dw * gate
    o_ref : (1, c_tile, hw_tile)  output tile
    """
    o_ref[...] = (x_ref[...] * s_ref[...]).astype(o_ref.dtype)


def _round_up(x, m):
    return (x + m - 1) // m * m


def _sublane_multiple(dtype):
    # Native (8, 128) tile at 32-bit; sub-32-bit dtypes pack along sublanes.
    return max(8, 32 // jnp.dtype(dtype).itemsize)


def _tpu_tile_config():
    """Per-generation (target_tile_bytes, vmem_limit_bytes, num_tensorcores)."""
    try:
        kind = jax.devices()[0].device_kind.lower()
    except Exception:
        kind = ""
    if "v7" in kind:
        # 64 MiB physical VMEM, 2 TCs/chip, 3.2 TB/s HBM: big tiles, capped limit.
        return 7 << 20, 44 << 20, 2
    if "v6" in kind:
        # 128 MiB physical VMEM, 1 TC, ~1.4 TB/s HBM.
        return 8 << 20, 64 << 20, 1
    # v5e / unknown: stay well inside the 16 MiB scoped-VMEM default.
    return 3 << 20, None, 1


def _choose_tiles(B, C, HW, itemsize, target_bytes, num_tcs, c_sub):
    """Pick (c_tile, hw_tile). hw_tile is a multiple of 128, c_tile a multiple
    of the dtype sublane packing (or full C); neither has to divide the array
    (ceil-div grid + masked ragged tail)."""
    hw_full = _round_up(HW, 128)
    lanes_budget = max(128, (target_bytes // max(1, C * itemsize)) // 128 * 128)

    c_tile = C
    if lanes_budget >= min(hw_full, 512) or C <= c_sub:
        hw_tile = min(hw_full, lanes_budget)
    else:
        # A full-C block would push the lane tile below ~512 (poor HBM
        # roofline regime); tile channels instead and keep >=512 lanes.
        hw_tile = min(hw_full, 512)
        c_budget = max(c_sub, (target_bytes // (hw_tile * itemsize)) // c_sub * c_sub)
        c_tile = min(C, c_budget)

    # Re-balance the lane tiles across the ceil-div grid (avoid a tiny tail).
    n_hw = pl.cdiv(HW, hw_tile)
    hw_tile = min(hw_tile, _round_up(pl.cdiv(HW, n_hw), 128))

    # Megacore (v7x): make sure every TensorCore gets at least two grid steps.
    min_steps = 2 * num_tcs
    while (B * pl.cdiv(C, c_tile) * pl.cdiv(HW, hw_tile) < min_steps
           and hw_tile > 128):
        hw_tile = _round_up(max(128, hw_tile // 2), 128)
    return c_tile, hw_tile


def separable_conv2d_attention(x_nchw, dw, w1, w2, *, _tile_override=None):
    """x_nchw: (B, C, H, W); dw: (C,); w1: (C//2, C); w2: (C, C//2)."""
    B, C, H, W = x_nchw.shape
    # PyTorch's center index ((H+1)//2, (W+1)//2) is out of range for H<=1 or
    # W<=1; PyTorch would raise, a clipped Pallas read would not — guard here.
    assert H > 1 and W > 1, "degenerate spatial dims: center index out of range"
    HW = H * W
    ci, cj = (H + 1) // 2, (W + 1) // 2

    # Tiny gate path in plain JAX on the (B, C) center slab: an M=1 matmul
    # wastes the MXU and would serialize the grid if kept in-kernel.
    xc = x_nchw[:, :, ci, cj].astype(jnp.float32)                # (B, C)
    hidden = jnp.maximum(xc @ w1.T.astype(jnp.float32), 0.0)     # (B, C//2)
    gate = jax.nn.sigmoid(hidden @ w2.T.astype(jnp.float32))     # (B, C)
    # Depthwise 1x1 conv weight folded into the per-(b, c) scale; kept in f32
    # so the single in-kernel multiply happens at full precision.
    scale = (dw[None, :].astype(jnp.float32) * gate).reshape(B, C, 1)

    # Zero-copy view: NCHW -> (B, C, HW); HW lands on the fast lane axis.
    x_bcs = x_nchw.reshape(B, C, HW)

    target_bytes, vmem_limit, num_tcs = _tpu_tile_config()
    c_sub = _sublane_multiple(x_nchw.dtype)
    if _tile_override is not None:
        c_tile, hw_tile = _tile_override
    else:
        c_tile, hw_tile = _choose_tiles(B, C, HW, x_nchw.dtype.itemsize,
                                        target_bytes, num_tcs, c_sub)

    grid = (B, pl.cdiv(C, c_tile), pl.cdiv(HW, hw_tile))

    out_bcs = pl.pallas_call(
        _scale_mul_kernel,
        out_shape=jax.ShapeDtypeStruct((B, C, HW), x_nchw.dtype),
        grid_spec=pltpu.PrefetchScalarGridSpec(
            num_scalar_prefetch=0,
            grid=grid,
            in_specs=[
                pl.BlockSpec((1, c_tile, hw_tile), lambda b, c, t: (b, c, t)),
                # Scale block index only changes per (batch, channel-block):
                # with HW innermost its tiny DMA is reissued B * n_c_blocks
                # times, not once per grid step.
                pl.BlockSpec((1, c_tile, 1), lambda b, c, t: (b, c, 0)),
            ],
            out_specs=pl.BlockSpec((1, c_tile, hw_tile), lambda b, c, t: (b, c, t)),
        ),
        compiler_params=pltpu.CompilerParams(
            dimension_semantics=("parallel", "parallel", "parallel"),
            vmem_limit_bytes=vmem_limit,
        ),
    )(x_bcs, scale)

    # Zero-copy view back to NCHW.
    return out_bcs.reshape(B, C, H, W)


def _reference(x_nchw, dw, w1, w2):
    B, C, H, W = x_nchw.shape
    xc = x_nchw[:, :, int((H + 1) / 2), int((W + 1) / 2)].astype(jnp.float32)
    x_conv = x_nchw.astype(jnp.float32) * dw[None, :, None, None].astype(jnp.float32)
    hidden = jnp.maximum(xc @ w1.T.astype(jnp.float32), 0.0)
    gate = jax.nn.sigmoid(hidden @ w2.T.astype(jnp.float32))
    return (x_conv * gate[:, :, None, None]).astype(x_nchw.dtype)


if __name__ == "__main__":
    key = jax.random.PRNGKey(0)
    kx, kdw, kw1, kw2, kx2 = jax.random.split(key, 5)

    # Primary check: module-sized small shapes, auto-chosen tiles.
    B, C, H, W = 2, 4, 16, 16
    x = jax.random.normal(kx, (B, C, H, W), dtype=jnp.float32)
    dw = jax.random.normal(kdw, (C,), dtype=jnp.float32) * 0.5          # conv1 weight (C,1,1,1)
    w1 = jax.random.normal(kw1, (C // 2, C), dtype=jnp.float32) * 0.5   # fc[0] weight (C//2,C,1,1)
    w2 = jax.random.normal(kw2, (C, C // 2), dtype=jnp.float32) * 0.5   # fc[2] weight (C,C//2,1,1)

    out = jax.block_until_ready(separable_conv2d_attention(x, dw, w1, w2))
    np.testing.assert_allclose(np.asarray(out),
                               np.asarray(_reference(x, dw, w1, w2)),
                               rtol=1e-5, atol=1e-5)

    # Secondary check: exercise the ceil-div / masked ragged-tail path
    # (HW = 20*20 = 400, not a multiple of 128) and the channel-tiling path
    # (forced c_tile=8 < C=16) on tiny shapes.
    B2, C2, H2, W2 = 2, 16, 20, 20
    x2 = jax.random.normal(kx2, (B2, C2, H2, W2), dtype=jnp.float32)
    dw2 = jax.random.normal(kdw, (C2,), dtype=jnp.float32) * 0.5
    w1b = jax.random.normal(kw1, (C2 // 2, C2), dtype=jnp.float32) * 0.5
    w2b = jax.random.normal(kw2, (C2, C2 // 2), dtype=jnp.float32) * 0.5
    out2 = jax.block_until_ready(
        separable_conv2d_attention(x2, dw2, w1b, w2b, _tile_override=(8, 128)))
    np.testing.assert_allclose(np.asarray(out2),
                               np.asarray(_reference(x2, dw2, w1b, w2b)),
                               rtol=1e-5, atol=1e-5)

    print("KERNEL_OK")
</pallas_src>

<mosaic_0001>
module attributes {stable_mosaic.version = 11 : i64} {
  func.func @_scale_mul_kernel(%arg0: i32, %arg1: i32, %arg2: i32, %arg3: memref<1x4x256xf32, #tpu.memory_space<vmem>>, %arg4: memref<1x4x1xf32, #tpu.memory_space<vmem>>, %arg5: memref<1x4x256xf32, #tpu.memory_space<vmem>>) attributes {dimension_semantics = [#tpu.dimension_semantics<parallel>, #tpu.dimension_semantics<parallel>, #tpu.dimension_semantics<parallel>], iteration_bounds = array<i64: 2, 1, 1>, scalar_prefetch = 0 : i64, scratch_operands = 0 : i64, tpu.core_type = #tpu.core_type<tc>, window_params = [{transform_indices = @transform_0, window_bounds = array<i64: 1, 4, 256>}, {transform_indices = @transform_1, window_bounds = array<i64: 1, 4, 1>}, {transform_indices = @transform_2, window_bounds = array<i64: 1, 4, 256>}]} {
    %c0 = arith.constant 0 : index
    %c0_0 = arith.constant 0 : index
    %c0_1 = arith.constant 0 : index
    %0 = vector.load %arg3[%c0, %c0_0, %c0_1] : memref<1x4x256xf32, #tpu.memory_space<vmem>>, vector<1x4x256xf32>
    %c0_2 = arith.constant 0 : index
    %c0_3 = arith.constant 0 : index
    %c0_4 = arith.constant 0 : index
    %1 = vector.load %arg4[%c0_2, %c0_3, %c0_4] : memref<1x4x1xf32, #tpu.memory_space<vmem>>, vector<1x4x1xf32>
    %2 = vector.broadcast %1 : vector<1x4x1xf32> to vector<1x4x256xf32>
    %3 = arith.mulf %0, %2 : vector<1x4x256xf32>
    %c0_5 = arith.constant 0 : index
    %c0_6 = arith.constant 0 : index
    %c0_7 = arith.constant 0 : index
    %4 = vector.load %arg5[%c0_5, %c0_6, %c0_7] : memref<1x4x256xf32, #tpu.memory_space<vmem>>, vector<1x4x256xf32>
    tpu.vector_store %arg5[%c0_5, %c0_6, %c0_7], %3 {strides = array<i32>} : memref<1x4x256xf32, #tpu.memory_space<vmem>>, vector<1x4x256xf32>,
    return
  }
  func.func @transform_0(%arg0: i32, %arg1: i32, %arg2: i32) -> (i32, i32, i32) {
    %c0_i32 = arith.constant 0 : i32
    return %arg0, %arg1, %arg2 : i32, i32, i32
  }
  func.func @transform_1(%arg0: i32, %arg1: i32, %arg2: i32) -> (i32, i32, i32) {
    %c0_i32 = arith.constant 0 : i32
    %c0_i32_0 = arith.constant 0 : i32
    return %arg0, %arg1, %c0_i32 : i32, i32, i32
  }
  func.func @transform_2(%arg0: i32, %arg1: i32, %arg2: i32) -> (i32, i32, i32) {
    %c0_i32 = arith.constant 0 : i32
    return %arg0, %arg1, %arg2 : i32, i32, i32
  }
}

</mosaic_0001>

<bundles_post_ra>
// kernel: tpu_custom_call.1
= control target key start
LH: loop header
LB: loop body
LE: loop exit
PB: predicated region body
PF: predicated region fallthrough
CT: control target
= control target key end

     0   :  { %7 = vsyncpa [#allocation3], 0  ;;  %s755_s0 = inlined_call_operand.hbm [shape: f32[2,4,256], index: 0, kind: input, shape index: {}]   ;;  %s756_s1 = inlined_call_operand.vmem [shape: f32[2,4,1], index: 1, kind: input, shape index: {}]   ;;  %s757_s2 = inlined_call_operand.hbm [shape: f32[2,4,256], index: 2, kind: output, shape index: {}]  }
   0x1   :  { %9 = vsyncpa [#allocation3 + $0x1], 0 }
   0x2   :  { %10 = vsyncpa [#allocation4], 0 }
   0x3   :  { %12 = vsyncpa [#allocation4 + $0x1], 0  ;;  %s578_s9 = smov 0   ;;  %s580_s10 = smov 0  }
   0x4   :  { %s582_s11 = smov 0   ;;  %s584_s12 = smov 0  }
   0x5   :  { %s586_s13 = smov 0   ;;  %s588_s14 = smov 0  }
   0x6 LB: > { %s362_s15 = sadd.s32 4294967295, %s557_s14   ;;  %s363_s16 = sadd.s32 4294967294, %s557_s14   ;;  %s557_s14 = sphi %s588_s14, %s18_s14   ;;  %s553_s13 = sphi %s586_s13, %s773_s13   ;;  %s549_s12 = sphi %s584_s12, %s772_s12   ;;  %s545_s11 = sphi %s582_s11, %s771_s11   ;;  %s541_s10 = sphi %s580_s10, %s770_s10   ;;  %s537_s9 = sphi %s578_s9, %s769_s9  }
   0x7   : > { %s37_s17 = sadd.s32 1, %s553_s13  ;;  %s48_s18 = sadd.s32 1, %s545_s11 }
   0x8   : > { %p39_p0 = scmp.ge.s32.totalorder %s37_s17, 2  ;;  %p55_p1 = scmp.ne.s32.totalorder %s545_s11, %s541_s10 }
   0x9   : > { %p56_p2 = scmp.eq.s32.totalorder %s557_s14, 0  ;;  %p61_p3 = scmp.ne.s32.totalorder %s541_s10, %s537_s9 }
   0xa   : > { %s775_s17 = smov (%p39_p0, %s37_s17), 0  ;;  %p62_p5 = scmp.eq.s32.totalorder %s362_s15, 0 }
   0xb   : > { %p619_p4 = por %p56_p2, %p55_p1  ;;  %s41_s20 = ssub.s32 %s553_s13, %s775_s17 }
   0xc   : > { %p117_p6 = scmp.eq.s32.totalorder %s362_s15, 1  ;;  %p46_p7 = scmp.eq.s32.totalorder %s41_s20, 0 }
   0xd   : > { %p625_p8 = por %p62_p5, %p61_p3  ;;  %p123_p10 = scmp.eq.s32.totalorder %s363_s16, 1 }
   0xe   : > { %p629_p9 = por %p117_p6, %p55_p1  ;;  %p392_p13 = scmp.lt.s32.totalorder %s557_s14, 2 }
   0xf   : > { %s634_s23 = scalar_select %p46_p7, %s545_s11, %s48_s18  }
  0x10   : > { %s761_s22 = scalar_select %p629_p9, 1, 0 }
  0x11   : > { %p636_p11 = por %p123_p10, %p61_p3  ;;  %s143_s25 = sand.u32 1, %s545_s11  }
  0x12   : > { %s366_s26 = sshll.u32 %s143_s25, 3  ;;  %s378_s27 = sshll.u32 %s553_s13, 7 }
  0x13   : > { %s762_s24 = scalar_select %p636_p11, 1, 0 }
  0x14   : > { %s647_s30 = scalar_lea.hbm %s755_s0, %s378_s27  ;;  %s147_s3 = scalar_lea.vmem [#allocation2], %s366_s26 }
  0x15   : > { %s159_s4 = sshll.u32 %s147_s3, 4  ;;  %p653_p0 = pnand %p392_p13, %p619_p4  ;;  %s649_s4 = int_to_ptr.vmem [resolvable:$true] %s159_s4 }
  0x16   : > { %s144_s6 = scalar_lea.sflag [#allocation3], %s143_s25  ;;  %s445_s7 = scalar_lea.hbm %s647_s30, 128 }
  0x17   : > { %p446_p3 = scmp.ne.s32.totalorder %s647_s30, %s445_s7  ;;  %p447_p5 = pneg %p653_p0 }
  0x18   : > { %s450_s16 = scalar_lea.hbm %s755_s0, 256  ;;  %p451_p4 = scmp.lt.u32.totalorder %s647_s30, %s755_s0 }
  0x19   : > { %p448_p6 = pnand %p447_p5, %p446_p3  ;;  %p452_p10 = scmp.lt.u32.totalorder %s450_s16, %s445_s7 }
  0x1a   : > { %p454_p12 = scmp.lt.u32.totalorder %s445_s7, %s647_s30 }
  0x1b   : > { %p449_p7 = pneg %p448_p6  ;;  %p453_p13 = por %p452_p10, %p451_p4 }
  0x1d   : > { %p455_p1 = por %p454_p12, %p453_p13 }
  0x1f   : > { %p456_p2 = pnand %p455_p1, %p449_p7 }
  0x21   : > { %459 = shalt.err (!%p456_p2)
}
  0x22   : > { %s460_s20 = scalar_lea.vmem %s649_s4, 128  ;;  %s559_s25 = smov [#allocation2]  }
  0x23   : > { %p461_p3 = scmp.ne.s32.totalorder %s649_s4, %s460_s20  ;;  %s465_s26 = sshll.u32 %s559_s25, 4  ;;  %s466_s26 = int_to_ptr.vmem [resolvable:$false] %s465_s26 }
  0x24   : > { %s467_s27 = scalar_lea.vmem %s466_s26, 256  ;;  %p468_p9 = scmp.lt.s32.totalorder %s649_s4, %s466_s26 }
  0x25   : > { %p463_p6 = pnand %p461_p3, %p447_p5  ;;  %p469_p4 = scmp.lt.s32.totalorder %s467_s27, %s460_s20 }
  0x27   : > { %p464_p11 = pneg %p463_p6  ;;  %p470_p10 = por %p469_p4, %p468_p9 }
  0x29   : > { %p471_p12 = pnand %p470_p10, %p464_p11 }
  0x2b   : > { %474 = shalt.err (!%p471_p12)
}
  0x2c   : > { %387 = dma.hbm_to_vmem [thread:$0]  (!%p653_p0), %s647_s30, 128, %s649_s4, %s144_s6  }
  0x2d   : > { %p764_p1 = scmp.lt.s32.totalorder %s557_s14, 3  ;;  %p765_p2 = scmp.ge.s32.totalorder %s557_s14, 1 }
  0x2f   : > { %p175_p5 = pnand %p765_p2, %p764_p1 }
  0x30   : > { %s689_s28 = sand.u32 (!%p175_p5), 1, %s541_s10  }
  0x31   : > { %178 = sbr.rel (%p175_p5) target bundleno = 210 (0xd2), region = 28  ;;  %s370_s29 = sshll.u32 (!%p175_p5), %s689_s28, 3 }
  0x32   : > { %s181_s3 = scalar_lea.sflag (!%p175_p5), [#allocation3], %s689_s28  ;;  %s184_s7 = scalar_lea.vmem (!%p175_p5), [#allocation2], %s370_s29 }
  0x38   : > { %528 = dma.done.wait (%p625_p8), %s181_s3, 128  }
  0x39   : > { %530 = vsyncadd (%p625_p8), %s181_s3, 4294967168  ;;  %p213_p9 = scmp.lt.s32.totalorder %s549_s12, 1  ;;  %v560_v0 = vmov 0   ;;  %v561_v2 = vmov 839922192   ;;  %v230_v4 = vlaneseq  ;;  %v221_v9 = vld [vmem:[%s184_s7] sm:$0xff] }
  0x3a   : > { %444 = vset.pattern.permute.xlu0 %v560_v0  ;;  %v228_v3 = vunpack.c.l.s4 %v561_v2  ;;  %s379_s21 = sshll.u32 %s549_s12, 7  ;;  %s211_s15 = scalar_lea.vmem [#allocation5], %s370_s29 }
  0x3b   : > { %s214_s30 = scalar_select %p213_p9, %s549_s12, 1  ;;  %v231_v6 = vshrl.u32 %v230_v4, 7 }
  0x3c   : > { %v229_v5 = vunpack.c.0.s8 %v228_v3  ;;  %s256_s16 = sshll.u32 %s211_s15, 4  ;;  %s706_s20 = scalar_lea.hbm %s757_s2, %s379_s21  ;;  %s708_s16 = int_to_ptr.vmem [resolvable:$true] %s256_s16 }
  0x3d   : > { %s372_s4 = sshll.u32 %s214_s30, 2  ;;  %s238_s25 = scalar_lea.sflag [#allocation4], %s689_s28 }
  0x3e   : > { %s219_s8 = scalar_lea.vmem %s756_s1, %s372_s4  ;;  %v232_v7 = vsub.s32 %v229_v5, %v231_v6  ;;  %s475_s26 = scalar_lea.vmem %s708_s16, 128 }
  0x3f   : > { %v222_v1 = vld [vmem:[%s219_s8] sm:$0xf]  ;;  %p476_p8 = scmp.ne.s32.totalorder %s708_s16, %s475_s26  ;;  %p766_p11 = scmp.ne.s32.totalorder %s761_s22, 0 }
  0x40   : > { %225 = vperm.xlu0 %444, %v222_v1   ;;  %s562_s12 = smov [#allocation5]  }
  0x41   : > { %p477_p0 = pnand %p476_p8, %p766_p11  ;;  %s479_s27 = sshll.u32 %s562_s12, 4  ;;  %s480_s27 = int_to_ptr.vmem [resolvable:$false] %s479_s27 }
  0x42   : > { %s481_s29 = scalar_lea.vmem %s480_s27, 256  ;;  %p482_p13 = scmp.lt.s32.totalorder %s708_s16, %s480_s27 }
  0x43   : > { %p478_p7 = pneg %p477_p0  ;;  %p483_p3 = scmp.lt.s32.totalorder %s481_s29, %s475_s26 }
  0x45   : > { %p484_p6 = por %p483_p3, %p482_p13 }
  0x47   : > { %p485_p4 = pnand %p484_p6, %p478_p7 }
  0xbf   : > { %v226_v8 = vpop.permute.xlu0 %225 }
  0xc0   : > { %v233_v10 = vrot.slane %v226_v8, %v232_v7 }
  0xc2   : > { %v235_v11 = vmul.f32 %v233_v10, %v221_v9 }
  0xc4   : > { %236 = vst [vmem:[%s211_s15] sm:$0xff] %v235_v11 }
  0xc5   : > { %488 = shalt.err (!%p485_p4)
}
  0xc6   : > { %s489_s28 = scalar_lea.hbm %s706_s20, 128  ;;  %s493_s30 = scalar_lea.hbm %s757_s2, 256 }
  0xc7   : > { %p490_p10 = scmp.ne.s32.totalorder %s706_s20, %s489_s28  ;;  %p494_p2 = scmp.lt.u32.totalorder %s706_s20, %s757_s2 }
  0xc8   : > { %p495_p5 = scmp.lt.u32.totalorder %s493_s30, %s489_s28  ;;  %p497_p8 = scmp.lt.u32.totalorder %s489_s28, %s706_s20 }
  0xc9   : > { %p491_p12 = pnand %p490_p10, %p766_p11 }
  0xca   : > { %p496_p9 = por %p495_p5, %p494_p2 }
  0xcb   : > { %p492_p1 = pneg %p491_p12 }
  0xcc   : > { %p498_p0 = por %p497_p8, %p496_p9 }
  0xce   : > { %p499_p7 = pnand %p498_p0, %p492_p1 }
  0xd0   : > { %502 = shalt.err (!%p499_p7)
}
  0xd1   : > { %382 = dma.vmem_to_hbm [thread:$0]  (%p766_p11), %s708_s16, 128, %s706_s20, %s238_s25  }
  0xd2 PF: > { %s268_s6 = sand.u32 1, %s537_s9   ;;  %p767_p13 = scmp.ne.s32.totalorder %s762_s24, 0 }
  0xd3   : > { %p768_p3 = scmp.ge.s32.totalorder %s557_s14, 2  ;;  %s269_s8 = scalar_lea.sflag [#allocation4], %s268_s6 }
  0xd5   : > { %p389_p6 = pnand %p768_p3, %p767_p13 }
  0xd7   : > { %532 = dma.done.wait (!%p389_p6), %s269_s8, 128  }
  0xd8   : > { %534 = vsyncadd (!%p389_p6), %s269_s8, 4294967168  ;;  %s18_s14 = sadd.s32 1, %s557_s14   ;;  %s769_s9 = smov %s541_s10 }
  0xd9   : > { %p15_p4 = scmp.ge.s32.totalorder %s18_s14, 4   ;;  %s770_s10 = smov %s545_s11 }
  0xda   : > { %s771_s11 = smov %s634_s23  ;;  %s772_s12 = smov %s553_s13 }
  0xdb   : > { %s773_s13 = smov %s775_s17  ;;  %17 = sbr.rel (!%p15_p4) target bundleno = 6 (0x6), region = 76 }
  0xe2   :  { %274 = vsyncpa [#allocation3], 1 }
  0xe3   :  { %276 = vsyncpa [#allocation3 + $0x1], 1 }
  0xe4   :  { %277 = vsyncpa [#allocation4], 1 }
  0xe5   :  { %279 = vsyncpa [#allocation4 + $0x1], 1 }

</bundles_post_ra>
